<compile_context>
chip_gen: v5e
topology: v5e:2x2
jax: 0.10.0
libtpu: 0.0.40
codegen_flags: <defaults>
</compile_context>

<pallas_src>
import functools
import math

import jax
import jax.numpy as jnp
from jax.experimental import pallas as pl
from jax.experimental.pallas import tpu as pltpu


# ---------------------------------------------------------------------------
# Algebraic short-circuit (no Pallas launch).  Softmax rows sum to 1 and every
# key carries the identical value row, so out[b, s, :] == value[0, 0, :].
# Plain XLA broadcast: zero launch overhead and fuses with consumers.
# ---------------------------------------------------------------------------
def attention_forward_shortcircuit(x1, value):
    B, S, _ = x1.shape
    Dv = value.shape[-1]
    return jnp.broadcast_to(value.astype(x1.dtype), (B, S, Dv))


# ---------------------------------------------------------------------------
# General attention kernel (shipped forward).
# ---------------------------------------------------------------------------
def _attn_kernel(x_ref, v_ref, o_ref, *, scale, total_b, mask_pad):
    x = x_ref[...]                                  # (Bt, S, D): q and k share one DMA'd tile
    bt, S, _ = x.shape
    dv = v_ref.shape[-1]

    # Scores: contract the shared feature axis directly (no explicit k.T).
    s = jnp.einsum("bqd,bkd->bqk", x, x,
                   preferred_element_type=jnp.float32) * scale

    if mask_pad:
        # Last grid step may read past B; zero padded rows so exp stays finite.
        b0 = pl.program_id(0) * bt
        bidx = jax.lax.broadcasted_iota(jnp.int32, (bt, S, S), 0) + b0
        s = jnp.where(bidx < total_b, s, 0.0)

    m = jnp.max(s, axis=-1, keepdims=True)
    p = jnp.exp(s - m)
    denom = jnp.sum(p, axis=-1, keepdims=True)
    # Exact reciprocal: denom is tiny and the EUP is nowhere near binding here.
    w = p * pl.reciprocal(denom, approx=False)

    # Shared (S, Dv) RHS: value row is identical for every key -> one 2-D MXU
    # matmul, no per-batch (Bt, S, Dv) value broadcast materialized in VMEM.
    v2d = jnp.broadcast_to(v_ref[0], (S, dv))       # (1, Dv) -> (S, Dv)
    out2 = jnp.dot(w.reshape(bt * S, S), v2d, preferred_element_type=jnp.float32)
    o_ref[...] = out2.reshape(bt, S, dv).astype(o_ref.dtype)


def _vmem_capacity_bytes(default=64 * 1024 * 1024):
    try:
        cap = getattr(pltpu.get_tpu_info(), "vmem_capacity_bytes", None)
        if cap:
            return int(cap)
    except Exception:
        pass
    return default  # conservative (v7x per-TC VMEM)


def attention_forward(x1, value, *, batch_tile=2048, use_bf16=False):
    """x1: (B, S, D) float32; value: (1, 1, Dv) float32 -> (B, S, Dv) float32."""
    B, S, D = x1.shape
    Dv = value.shape[-1]
    # Faithful to the torch module: inv_scale = sqrt(k.size(1)) == sqrt(S)
    # (NOT the conventional 1/sqrt(D)).
    scale = 1.0 / math.sqrt(S)

    in_dtype = jnp.bfloat16 if use_bf16 else x1.dtype
    itemsize = jnp.dtype(in_dtype).itemsize

    # Device-aware batch-tile cap: budget double-buffered x/out blocks plus
    # f32 score temps against physical VMEM (64 MiB v7x, 128 MiB v5e/v6e).
    cap = _vmem_capacity_bytes()
    per_elem = (2 * S * D * itemsize        # x block, double buffered
                + 2 * S * Dv * 4            # out block, double buffered (f32)
                + 4 * S * S * 4)            # s/p/w score temps (f32)
    bt_cap = max(1, (cap // 2) // per_elem)
    Bt = max(1, min(B, batch_tile, bt_cap))
    # v7x has 2 TensorCores: keep >= 2 parallel grid steps whenever B allows.
    if B >= 2 and pl.cdiv(B, Bt) < 2:
        Bt = pl.cdiv(B, 2)
    grid = (pl.cdiv(B, Bt),)
    mask_pad = (B % Bt) != 0

    vmem_limit = int(min(cap, max(32 * 1024 * 1024, 3 * Bt * per_elem)))

    kernel = functools.partial(_attn_kernel, scale=scale, total_b=B,
                               mask_pad=mask_pad)

    return pl.pallas_call(
        kernel,
        out_shape=jax.ShapeDtypeStruct((B, S, Dv), x1.dtype),
        grid_spec=pltpu.PrefetchScalarGridSpec(
            num_scalar_prefetch=0,
            grid=grid,
            in_specs=[
                pl.BlockSpec((Bt, S, D), lambda b: (b, 0, 0)),   # x1 (q and k share)
                pl.BlockSpec((1, 1, Dv), lambda b: (0, 0, 0)),   # value (VMEM-resident)
            ],
            out_specs=pl.BlockSpec((Bt, S, Dv), lambda b: (b, 0, 0)),
        ),
        compiler_params=pltpu.CompilerParams(
            dimension_semantics=("parallel",),
            vmem_limit_bytes=vmem_limit,
        ),
    )(x1.astype(in_dtype), value.astype(jnp.float32))


def reference_forward(x1, value):
    """Pure-JAX reference of the same (fixed) semantics."""
    B, S, D = x1.shape
    scale = 1.0 / math.sqrt(S)
    s = jnp.einsum("bsd,btd->bst", x1, x1) * scale
    w = jax.nn.softmax(s, axis=-1)
    v_full = jnp.broadcast_to(value, (B, S, value.shape[-1]))
    return jnp.einsum("bst,btv->bsv", w, v_full)


if __name__ == "__main__":
    key = jax.random.PRNGKey(0)
    k_x, k_key, k_val = jax.random.split(key, 3)

    # Shapes implied by the module: x1 = (1, 8, 64), value param = (1, 1, 5).
    x1 = jax.random.normal(k_x, (1, 8, 64), dtype=jnp.float32)
    key_param = jax.random.normal(k_key, (8, 7, 5), dtype=jnp.float32)  # unused, as in torch
    value_param = jax.random.normal(k_val, (1, 1, 5), dtype=jnp.float32)

    ref = reference_forward(x1, value_param)

    # Shipped Pallas forward (full attention pattern), exact-reciprocal softmax.
    out = attention_forward(x1, value_param)
    out = jax.block_until_ready(out)
    assert out.shape == (1, 8, 5), out.shape
    assert jnp.allclose(out, ref, atol=1e-5, rtol=1e-5), "Pallas kernel mismatch vs reference"

    # Algebraic short-circuit (no Pallas launch), per perf review item 1.
    out_sc = jax.block_until_ready(attention_forward_shortcircuit(x1, value_param))
    assert jnp.allclose(out_sc, ref, atol=1e-5, rtol=1e-5), "short-circuit mismatch vs reference"

    # Extra robustness check: multi-step parallel grid + padded-row masking
    # (B=5 -> Bt=3, grid=2, last step masked).
    x1b = jax.random.normal(k_x, (5, 8, 64), dtype=jnp.float32)
    refb = reference_forward(x1b, value_param)
    outb = jax.block_until_ready(attention_forward(x1b, value_param))
    assert outb.shape == (5, 8, 5), outb.shape
    assert jnp.allclose(outb, refb, atol=1e-5, rtol=1e-5), "tiled/masked path mismatch vs reference"

    print("KERNEL_OK")
</pallas_src>

<mosaic_0001>
module attributes {stable_mosaic.version = 11 : i64} {
  func.func @_attn_kernel(%arg0: i32, %arg1: memref<1x8x64xf32, #tpu.memory_space<vmem>>, %arg2: memref<1x1x5xf32, #tpu.memory_space<vmem>>, %arg3: memref<1x8x5xf32, #tpu.memory_space<vmem>>) attributes {dimension_semantics = [#tpu.dimension_semantics<parallel>], iteration_bounds = array<i64: 1>, scalar_prefetch = 0 : i64, scratch_operands = 0 : i64, tpu.core_type = #tpu.core_type<tc>, window_params = [{transform_indices = @transform_0, window_bounds = array<i64: 1, 8, 64>}, {pipeline_mode = #tpu.pipeline_mode<synchronous>, transform_indices = @transform_1, window_bounds = array<i64: 1, 1, 5>}, {transform_indices = @transform_2, window_bounds = array<i64: 1, 8, 5>}]} {
    %c0 = arith.constant 0 : index
    %c0_0 = arith.constant 0 : index
    %c0_1 = arith.constant 0 : index
    %0 = vector.load %arg1[%c0, %c0_0, %c0_1] : memref<1x8x64xf32, #tpu.memory_space<vmem>>, vector<1x8x64xf32>
    "tpu.trace_start"() <{level = 10 : i32, message = "bqd,bkd->bqk"}> : () -> ()
    %cst = arith.constant dense<0.000000e+00> : vector<1x8x8xf32>
    %1 = tpu.matmul %0, %0, %cst {dimension_numbers = #tpu.dot_dimension_numbers<[2], [2], [1], [1], [0, 0, 0, 1, 1, 1], [0], [0]>} : vector<1x8x64xf32>, vector<1x8x64xf32>, vector<1x8x8xf32> -> vector<1x8x8xf32>
    "tpu.trace_stop"() : () -> ()
    %cst_2 = arith.constant 0.353553385 : f32
    %2 = vector.broadcast %cst_2 : f32 to vector<1x8x8xf32>
    %3 = arith.mulf %1, %2 : vector<1x8x8xf32>
    %cst_3 = arith.constant dense<0xFF800000> : vector<1x8xf32>
    %4 = vector.multi_reduction <maximumf>, %3, %cst_3 [2] : vector<1x8x8xf32> to vector<1x8xf32>
    %5 = vector.shape_cast %4 : vector<1x8xf32> to vector<1x8x1xf32>
    %6 = vector.broadcast %5 : vector<1x8x1xf32> to vector<1x8x8xf32>
    %7 = arith.subf %3, %6 : vector<1x8x8xf32>
    %8 = math.exp %7 : vector<1x8x8xf32>
    %cst_4 = arith.constant dense<0.000000e+00> : vector<1x8xf32>
    %9 = vector.multi_reduction <add>, %8, %cst_4 [2] : vector<1x8x8xf32> to vector<1x8xf32>
    %10 = vector.shape_cast %9 : vector<1x8xf32> to vector<1x8x1xf32>
    %11 = tpu.reciprocal %10 : vector<1x8x1xf32> -> vector<1x8x1xf32>
    %12 = vector.broadcast %11 : vector<1x8x1xf32> to vector<1x8x8xf32>
    %13 = arith.mulf %8, %12 : vector<1x8x8xf32>
    %c0_5 = arith.constant 0 : index
    %c0_6 = arith.constant 0 : index
    %c0_7 = arith.constant 0 : index
    %14 = vector.load %arg2[%c0_5, %c0_6, %c0_7] : memref<1x1x5xf32, #tpu.memory_space<vmem>>, vector<1x1x5xf32>
    %15 = vector.shape_cast %14 : vector<1x1x5xf32> to vector<1x5xf32>
    %16 = vector.shape_cast %15 : vector<1x5xf32> to vector<1x5xf32>
    %17 = vector.broadcast %16 : vector<1x5xf32> to vector<8x5xf32>
    %18 = vector.shape_cast %13 : vector<1x8x8xf32> to vector<8x8xf32>
    %cst_8 = arith.constant dense<0.000000e+00> : vector<8x5xf32>
    %19 = tpu.matmul %18, %17, %cst_8 {dimension_numbers = #tpu.dot_dimension_numbers<[1], [0], [0], [1], [0, 0, 1, 1], [], []>} : vector<8x8xf32>, vector<8x5xf32>, vector<8x5xf32> -> vector<8x5xf32>
    %20 = vector.shape_cast %19 : vector<8x5xf32> to vector<1x8x5xf32>
    %c0_9 = arith.constant 0 : index
    %c0_10 = arith.constant 0 : index
    %c0_11 = arith.constant 0 : index
    %21 = vector.load %arg3[%c0_9, %c0_10, %c0_11] : memref<1x8x5xf32, #tpu.memory_space<vmem>>, vector<1x8x5xf32>
    tpu.vector_store %arg3[%c0_9, %c0_10, %c0_11], %20 {strides = array<i32>} : memref<1x8x5xf32, #tpu.memory_space<vmem>>, vector<1x8x5xf32>,
    return
  }
  func.func @transform_0(%arg0: i32) -> (i32, i32, i32) {
    %c0_i32 = arith.constant 0 : i32
    %c0_i32_0 = arith.constant 0 : i32
    %c0_i32_1 = arith.constant 0 : i32
    return %arg0, %c0_i32, %c0_i32_0 : i32, i32, i32
  }
  func.func @transform_1(%arg0: i32) -> (i32, i32, i32) {
    %c0_i32 = arith.constant 0 : i32
    %c0_i32_0 = arith.constant 0 : i32
    %c0_i32_1 = arith.constant 0 : i32
    %c0_i32_2 = arith.constant 0 : i32
    return %c0_i32, %c0_i32_0, %c0_i32_1 : i32, i32, i32
  }
  func.func @transform_2(%arg0: i32) -> (i32, i32, i32) {
    %c0_i32 = arith.constant 0 : i32
    %c0_i32_0 = arith.constant 0 : i32
    %c0_i32_1 = arith.constant 0 : i32
    return %arg0, %c0_i32, %c0_i32_0 : i32, i32, i32
  }
}

</mosaic_0001>

<bundles_post_ra>
// kernel: tpu_custom_call.1
= control target key start
LH: loop header
LB: loop body
LE: loop exit
PB: predicated region body
PF: predicated region fallthrough
CT: control target
= control target key end

     0   :  { %7 = vsyncpa [#allocation3], 0  ;;  %s216_s0 = inlined_call_operand.hbm [shape: f32[1,8,64], index: 0, kind: input, shape index: {}]   ;;  %s217_s1 = inlined_call_operand.hbm [shape: f32[1,1,5], index: 1, kind: input, shape index: {}]   ;;  %s218_s2 = inlined_call_operand.vmem [shape: f32[1,8,5], index: 2, kind: output, shape index: {}]  }
   0x1   :  { %s14_s11 = sshll.u32 %s216_s0, 4  ;;  %s15_s11 = int_to_ptr.hbm [resolvable:$true] %s14_s11 }
   0x2   :  { %8 = vsyncpa [#allocation5], 0  ;;  %s187_s12 = smov [#allocation2]   ;;  %s25_s16 = sshll.u32 %s217_s1, 4  ;;  %s26_s16 = int_to_ptr.hbm [resolvable:$true] %s25_s16 }
   0x3   :  { %s16_s13 = sshll.u32 %s187_s12, 4  ;;  %s188_s17 = smov [#allocation4]   ;;  %s17_s13 = int_to_ptr.vmem [resolvable:$true] %s16_s13 }
   0x4   :  { %19 = dma.hbm_to_vmem [thread:$0]  %s15_s11, 128, %s17_s13, [#allocation3]  }
   0x5   :  { %s27_s18 = sshll.u32 %s188_s17, 4  ;;  %s28_s18 = int_to_ptr.vmem [resolvable:$true] %s27_s18 }
   0x6   :  { %30 = dma.hbm_to_vmem [thread:$0]  %s26_s16, 16, %s28_s18, [#allocation5]  }
   0x7   :  { %183 = dma.done.wait [#allocation3], 128  }
   0x8   :  { %184 = vsyncadd [#allocation3], 4294967168 }
   0x9   :  { %185 = dma.done.wait [#allocation5], 16  }
   0xa   :  { %186 = vsyncadd [#allocation5], 4294967280  ;;  %vm40_vm0 = vcmask 523264   ;;  %v39_v0 = vld [vmem:[#allocation2] sm:$0xff]  ;;  %vm65_vm1 = vcmask 64512   ;;  %vm117_vm6 = vcmask 39936  }
   0xb   :  { %125 = vmatpush.xpose.msk.msra.mxu0 %vm40_vm0, %v39_v0  ;;  %v130_v9 = vld [vmem:[#allocation4] ss:$0 sm:$0xff] }
   0xc   :  { %112 = vmatpush.msra.mxu1 %v130_v9 }
   0xe   :  { %126 = vmatmul.msk.f32.vlgmr.msra.gmra.mxu0 %vm40_vm0, %v39_v0 }
  0x8b   :  { %v61_v1 = vpop.f32.mrf.mxu0 }
  0x8c   :  { %v64_v2 = vmul.f32 0.35355338, %v61_v1 }
  0x8e   :  { %v66_v3 = vsel %vm65_vm1, %v64_v2, -inf }
  0x8f   :  { %67 = vmax.xlane.f32.xlu0 %v66_v3 }
 0x102   :  { %v68_v4 = vpop.xlane.xlu0 %67 }
 0x103   :  { %v69_v5 = vsub.f32 %v64_v2, %v68_v4 }
 0x105   :  { %v70_v6 = vmul.f32 1.442695, %v69_v5 }
 0x107   :  { %131 = vpow2.f32 %v70_v6 }
 0x10d   :  { %v132_v7 = vpop.eup %131 }
 0x10e   :  { %v72_v8 = vsel %vm65_vm1, %v132_v7, 0.0 }
 0x10f   :  { %73 = vadd.xlane.f32.xlu0 %v72_v8 }
 0x182   :  { %v74_v10 = vpop.xlane.xlu0 %73 }
 0x183   :  { %133 = vrcp.f32 %v74_v10  ;;  %v86_v14 = vand.u32 2147483648, %v74_v10  ;;  %v84_v16 = vand.u32 2147483647, %v74_v10  ;;  %vm80_vm3 = vweird.f32 %v74_v10 }
 0x185   :  { %v87_v18 = vor.u32 1.1754944e-38, %v86_v14  ;;  %vm85_vm5 = vcmp.eq.f32.partialorder %v84_v16, 8.507059e+37 }
 0x189   :  { %v134_v11 = vpop.eup %133 }
 0x18a   :  { %v76_v12 = vmul.f32 %v134_v11, %v74_v10  ;;  %vm81_vm2 = vweird.f32 %v134_v11 }
 0x18b   :  { %vm82_vm4 = vmor %vm80_vm3, %vm81_vm2 }
 0x18c   :  { %v77_v13 = vsub.f32 1.0, %v76_v12 }
 0x18e   :  { %v78_v15 = vmul.f32 %v134_v11, %v77_v13 }
 0x190   :  { %v79_v17 = vadd.f32 %v134_v11, %v78_v15 }
 0x192   :  { %v83_v19 = vsel %vm82_vm4, %v134_v11, %v79_v17 }
 0x193   :  { %v88_v20 = vsel %vm85_vm5, %v87_v18, %v83_v19 }
 0x194   :  { %v89_v21 = vmul.f32 %v132_v7, %v88_v20 }
 0x196   :  { %127 = vmatmul.msk.f32.vlgmr.msra.gmra.mxu1 %vm65_vm1, %v89_v21 }
 0x213   :  { %v114_v22 = vpop.f32.mrf.mxu1 }
 0x214   :  { %118 = vst.msk [vmem:[%s218_s2] sm:$0xff] %vm117_vm6, %v114_v22 }
 0x215   :  { %123 = vsyncpa [#allocation3], 1 }
 0x216   :  { %124 = vsyncpa [#allocation5], 1 }

</bundles_post_ra>
